<compile_context>
chip_gen: v7x
topology: tpu7x:2x2x1
jax: 0.10.0
libtpu: 0.0.40
codegen_flags: <defaults>
</compile_context>

<pallas_src>
import functools
import math

import jax
import jax.numpy as jnp
from jax.experimental import pallas as pl
from jax.experimental.pallas import tpu as pltpu


def _round_up(x, m):
    return (x + m - 1) // m * m


def _largest_divisor_leq(n, cap):
    for d in range(min(n, cap), 0, -1):
        if n % d == 0:
            return d
    return 1


# ----------------------------------------------------------------------------
# Kernel 1: UnionLayer elementwise add with node-embedding broadcast (tiled)
# ----------------------------------------------------------------------------
def _union_add_kernel(x_ref, g_ref, o_ref):
    # x: (rt, T, D), g: (rt, 1, D) broadcast over T (sublane axis)
    o_ref[...] = x_ref[...] + g_ref[...]


def union_add(x_rows, g_rows, bytes_budget=2 << 20):
    R, T, D = x_rows.shape
    row_bytes = T * D * 4
    rt = max(1, min(R, bytes_budget // max(row_bytes, 1)))
    while R % rt:
        rt -= 1
    return pl.pallas_call(
        _union_add_kernel,
        out_shape=jax.ShapeDtypeStruct((R, T, D), x_rows.dtype),
        grid=(R // rt,),
        in_specs=[pl.BlockSpec((rt, T, D), lambda r: (r, 0, 0)),
                  pl.BlockSpec((rt, 1, D), lambda r: (r, 0, 0))],
        out_specs=pl.BlockSpec((rt, T, D), lambda r: (r, 0, 0)),
        compiler_params=pltpu.CompilerParams(dimension_semantics=("parallel",)),
    )(x_rows, g_rows)


# ----------------------------------------------------------------------------
# Kernel 2: fused input projection for both LSTM directions
#   (S*B, D) @ (2, D, 4H) + (2, 1, 4H)  ->  (2, S*B, 4H)
# ----------------------------------------------------------------------------
def _dual_linear_kernel(x_ref, w_ref, b_ref, o_ref):
    o_ref[...] = (jnp.dot(x_ref[...], w_ref[...],
                          preferred_element_type=jnp.float32) + b_ref[...])


def dual_linear(x2d, w_st, b_st, tm=256):
    M, K = x2d.shape
    nd, _, G = w_st.shape
    tm = min(tm, _round_up(M, 8))
    Mp = _round_up(M, tm)
    if Mp != M:
        x2d = jnp.pad(x2d, ((0, Mp - M), (0, 0)))
    out = pl.pallas_call(
        _dual_linear_kernel,
        out_shape=jax.ShapeDtypeStruct((nd, Mp, G), jnp.float32),
        grid=(nd, Mp // tm),
        in_specs=[
            pl.BlockSpec((tm, K), lambda d, m: (m, 0)),
            pl.BlockSpec((None, K, G), lambda d, m: (d, 0, 0)),
            pl.BlockSpec((None, 1, G), lambda d, m: (d, 0, 0)),
        ],
        out_specs=pl.BlockSpec((None, tm, G), lambda d, m: (d, m, 0)),
        compiler_params=pltpu.CompilerParams(
            dimension_semantics=("parallel", "parallel")),
    )(x2d, w_st, b_st)
    return out[:, :M, :]


# ----------------------------------------------------------------------------
# Kernel 3: BiLSTM recurrence, both directions in one call
#   grid = (direction "parallel", time-chunk "arbitrary"); per chunk an
#   unrolled loop over Tc timesteps: gates = xproj[t] + h @ W_hh.
# ----------------------------------------------------------------------------
def _bilstm_kernel(xp_ref, vm_ref, whh_ref, o_ref, h_scr, c_scr, *,
                   tc_size, hidden):
    d = pl.program_id(0)       # 0 = forward, 1 = backward
    tb = pl.program_id(1)      # time-chunk index (already reversed for d==1)

    @pl.when(tb == 0)
    def _init():
        h_scr[...] = jnp.zeros_like(h_scr)
        c_scr[...] = jnp.zeros_like(c_scr)

    whh = whh_ref[...]                                   # (H, 4H)

    def step(i, carry):
        h, c = carry
        # within-chunk row: forward walks 0..Tc-1, backward walks Tc-1..0
        row = i + d * (tc_size - 1 - 2 * i)
        gates = xp_ref[row] + jnp.dot(h, whh,
                                      preferred_element_type=jnp.float32)
        i_g = jax.nn.sigmoid(gates[:, :hidden])          # PyTorch order i,f,g,o
        f_g = jax.nn.sigmoid(gates[:, hidden:2 * hidden])
        g_g = jnp.tanh(gates[:, 2 * hidden:3 * hidden])
        o_g = jax.nn.sigmoid(gates[:, 3 * hidden:])
        c_new = f_g * c + i_g * g_g
        h_new = o_g * jnp.tanh(c_new)
        valid = vm_ref[row]                              # (B, 1) in {0., 1.}
        h = valid * h_new + (1.0 - valid) * h
        c = valid * c_new + (1.0 - valid) * c
        # pad_packed_sequence padding_value = keys_vocab '<pad>' assumed 0.0
        o_ref[row] = valid * h_new
        return h, c

    h_fin, c_fin = jax.lax.fori_loop(0, tc_size, step,
                                     (h_scr[...], c_scr[...]), unroll=True)
    h_scr[...] = h_fin
    c_scr[...] = c_fin


def bilstm_recurrence(xproj, valid_tm, w_hh_st, hidden, time_chunk=32):
    # xproj: (2, S, B, 4H), valid_tm: (S, B, 1), w_hh_st: (2, H, 4H)
    nd, S, B, G = xproj.shape
    Tc = _largest_divisor_leq(S, time_chunk)
    nT = S // Tc
    kernel = functools.partial(_bilstm_kernel, tc_size=Tc, hidden=hidden)

    def tmap(d, t):
        # forward (d==0): chunks 0..nT-1; backward (d==1): chunks reversed
        return t + d * (nT - 1 - 2 * t)

    return pl.pallas_call(
        kernel,
        out_shape=jax.ShapeDtypeStruct((2, S, B, hidden), jnp.float32),
        grid_spec=pltpu.PrefetchScalarGridSpec(
            num_scalar_prefetch=0,
            grid=(2, nT),
            in_specs=[
                pl.BlockSpec((None, Tc, B, G),
                             lambda d, t: (d, tmap(d, t), 0, 0)),
                pl.BlockSpec((Tc, B, 1),
                             lambda d, t: (tmap(d, t), 0, 0)),
                pl.BlockSpec((None, hidden, G),
                             lambda d, t: (d, 0, 0)),
            ],
            out_specs=pl.BlockSpec((None, Tc, B, hidden),
                                   lambda d, t: (d, tmap(d, t), 0, 0)),
            scratch_shapes=[pltpu.VMEM((B, hidden), jnp.float32),
                            pltpu.VMEM((B, hidden), jnp.float32)],
        ),
        compiler_params=pltpu.CompilerParams(
            dimension_semantics=("parallel", "arbitrary")),
    )(xproj, valid_tm, w_hh_st)


# ----------------------------------------------------------------------------
# Kernel 4: MLPLayer (hidden_dims=None) == Linear(2H -> num_tags), fused over
#   both direction halves: logits = h_fwd @ W_top + h_bwd @ W_bot + b
#   (padded, lane-dense tag dim; avoids concatenating the LSTM outputs)
# ----------------------------------------------------------------------------
def _mlp_kernel(h_ref, w_ref, b_ref, o_ref):
    o_ref[...] = (jnp.dot(h_ref[0], w_ref[0], preferred_element_type=jnp.float32)
                  + jnp.dot(h_ref[1], w_ref[1], preferred_element_type=jnp.float32)
                  + b_ref[...])


def mlp_logits(h_st, w_st, b_pad, tm=256):
    nd, M, H = h_st.shape
    P = w_st.shape[-1]
    tm = min(tm, _round_up(M, 8))
    Mp = _round_up(M, tm)
    if Mp != M:
        h_st = jnp.pad(h_st, ((0, 0), (0, Mp - M), (0, 0)))
    out = pl.pallas_call(
        _mlp_kernel,
        out_shape=jax.ShapeDtypeStruct((Mp, P), jnp.float32),
        grid=(Mp // tm,),
        in_specs=[
            pl.BlockSpec((nd, tm, H), lambda m: (0, m, 0)),
            pl.BlockSpec((nd, H, P), lambda m: (0, 0, 0)),
            pl.BlockSpec((1, P), lambda m: (0, 0)),
        ],
        out_specs=pl.BlockSpec((tm, P), lambda m: (m, 0)),
        compiler_params=pltpu.CompilerParams(dimension_semantics=("parallel",)),
    )(h_st, w_st, b_pad)
    return out[:M]


# ----------------------------------------------------------------------------
# Decoder forward (eval mode)
# ----------------------------------------------------------------------------
def decoder_forward(params, x, x_gcn, mask, length, tags=None):
    B, N, T, D = x.shape
    H = params["hidden"]
    num_tags = params["num_tags"]
    S = N * T                                        # static padded doc length

    # ---- UnionLayer --------------------------------------------------------
    x_sum = union_add(x.reshape(B * N, T, D),
                      x_gcn.reshape(B * N, 1, D)).reshape(B, S, D)
    mask_flat = mask.reshape(B, S)
    doc_seq_len = jnp.sum(length, axis=-1).astype(jnp.int32)          # (B,)

    # Stable argsort moves mask==1 tokens to the front of each document while
    # preserving token order (data-dependent gather -> XLA glue).
    order = jnp.argsort(jnp.where(mask_flat == 1, 0, 1), axis=1, stable=True)
    new_x = jnp.take_along_axis(x_sum, order[:, :, None], axis=1)     # (B,S,D)
    new_mask_full = (jnp.arange(S)[None, :]
                     < doc_seq_len[:, None]).astype(mask.dtype)       # (B,S)

    # ---- BiLSTMLayer -------------------------------------------------------
    # Time-major layout (S, B, D); validity mask gates the packed recurrence.
    x_tm = jnp.transpose(new_x, (1, 0, 2))
    valid_tm = (jnp.arange(S)[:, None]
                < doc_seq_len[None, :]).astype(jnp.float32)[:, :, None]

    # Input projection (+ b_ih + b_hh) for BOTH directions in one big matmul.
    xproj = dual_linear(x_tm.reshape(S * B, D), params["w_ih"], params["b"])
    xproj = xproj.reshape(2, S, B, 4 * H)

    # Sequential recurrence: only h @ W_hh + gate nonlinearities per step.
    h_both = bilstm_recurrence(xproj, valid_tm, params["w_hh"], H)    # (2,S,B,H)

    # MLPLayer on the two direction halves (no concat / large transpose).
    logits_flat = mlp_logits(h_both.reshape(2, S * B, H),
                             params["w_mlp"], params["b_mlp"])        # (S*B, P)
    logits_full = jnp.transpose(
        logits_flat.reshape(S, B, -1)[:, :, :num_tags], (1, 0, 2))    # (B,S,tags)

    # Truncate to max_doc_seq_len (reference semantics). All heavy kernels ran
    # at the static length S; only this final slice touches the host value.
    max_doc_seq_len = int(jnp.max(doc_seq_len))
    logits = logits_full[:, :max_doc_seq_len, :]
    new_mask = new_mask_full[:, :max_doc_seq_len]

    # TODO(synk): CRF log-likelihood is a training-only branch -> None in eval.
    return logits, new_mask, None


# ----------------------------------------------------------------------------
# Deterministic parameter init (synthetic; shapes follow nn.LSTM / nn.Linear)
# ----------------------------------------------------------------------------
def init_params(key, D, H, num_tags):
    tag_pad = _round_up(num_tags, 128)               # lane-dense MLP output
    ks = jax.random.split(key, 6)
    s = 1.0 / math.sqrt(H)
    s2 = 1.0 / math.sqrt(2 * H)

    def u(k, shape, scale):
        return jax.random.uniform(k, shape, jnp.float32, -scale, scale)

    w_mlp = u(ks[4], (2, H, num_tags), s2)           # [W_top(fwd); W_bot(bwd)]
    b_mlp = u(ks[5], (1, num_tags), s2)
    return {
        "hidden": H,
        "num_tags": num_tags,
        # Fused LSTM weights: gate order (i, f, g, o) along the 4H axis,
        # leading dim 0 = forward direction, 1 = backward direction.
        "w_ih": u(ks[0], (2, D, 4 * H), s),
        "w_hh": u(ks[1], (2, H, 4 * H), s),
        "b":    u(ks[2], (2, 1, 4 * H), s) + u(ks[3], (2, 1, 4 * H), s),
        # MLPLayer Linear(2H -> num_tags), split per direction, padded to 128.
        "w_mlp": jnp.pad(w_mlp, ((0, 0), (0, 0), (0, tag_pad - num_tags))),
        "b_mlp": jnp.pad(b_mlp, ((0, 0), (0, tag_pad - num_tags))),
    }


if __name__ == "__main__":
    key = jax.random.PRNGKey(0)
    B, N, T, D, H, NUM_TAGS = 2, 3, 4, 32, 64, 5

    k1, k2, k3, kp = jax.random.split(key, 4)
    x = jax.random.normal(k1, (B, N, T, D), jnp.float32)      # encoder output
    x_gcn = jax.random.normal(k2, (B, N, D), jnp.float32)     # graph embedding
    length = jax.random.randint(k3, (B, N), 1, T + 1).astype(jnp.int32)
    mask = (jnp.arange(T)[None, None, :] < length[:, :, None]).astype(jnp.int32)
    tags = jnp.zeros((B, N, T), jnp.int32)                    # unused in eval

    params = init_params(kp, D, H, NUM_TAGS)

    logits, new_mask, log_likelihood = decoder_forward(
        params, x, x_gcn, mask, length, tags)
    jax.block_until_ready((logits, new_mask))

    S_max = int(jnp.max(jnp.sum(length, axis=-1)))
    assert logits.shape == (B, S_max, NUM_TAGS), logits.shape
    assert new_mask.shape == (B, S_max), new_mask.shape
    assert log_likelihood is None
    print("KERNEL_OK")
</pallas_src>

<mosaic_0001>
module attributes {stable_mosaic.version = 11 : i64} {
  func.func @_union_add_kernel(%arg0: i32, %arg1: memref<6x4x32xf32, #tpu.memory_space<vmem>>, %arg2: memref<6x1x32xf32, #tpu.memory_space<vmem>>, %arg3: memref<6x4x32xf32, #tpu.memory_space<vmem>>) attributes {dimension_semantics = [#tpu.dimension_semantics<parallel>], iteration_bounds = array<i64: 1>, scalar_prefetch = 0 : i64, scratch_operands = 0 : i64, tpu.core_type = #tpu.core_type<tc>, window_params = [{transform_indices = @transform_0, window_bounds = array<i64: 6, 4, 32>}, {transform_indices = @transform_1, window_bounds = array<i64: 6, 1, 32>}, {transform_indices = @transform_2, window_bounds = array<i64: 6, 4, 32>}]} {
    %c0 = arith.constant 0 : index
    %c0_0 = arith.constant 0 : index
    %c0_1 = arith.constant 0 : index
    %0 = vector.load %arg1[%c0, %c0_0, %c0_1] : memref<6x4x32xf32, #tpu.memory_space<vmem>>, vector<6x4x32xf32>
    %c0_2 = arith.constant 0 : index
    %c0_3 = arith.constant 0 : index
    %c0_4 = arith.constant 0 : index
    %1 = vector.load %arg2[%c0_2, %c0_3, %c0_4] : memref<6x1x32xf32, #tpu.memory_space<vmem>>, vector<6x1x32xf32>
    %2 = vector.broadcast %1 : vector<6x1x32xf32> to vector<6x4x32xf32>
    %3 = arith.addf %0, %2 : vector<6x4x32xf32>
    %c0_5 = arith.constant 0 : index
    %c0_6 = arith.constant 0 : index
    %c0_7 = arith.constant 0 : index
    %4 = vector.load %arg3[%c0_5, %c0_6, %c0_7] : memref<6x4x32xf32, #tpu.memory_space<vmem>>, vector<6x4x32xf32>
    tpu.vector_store %arg3[%c0_5, %c0_6, %c0_7], %3 {strides = array<i32>} : memref<6x4x32xf32, #tpu.memory_space<vmem>>, vector<6x4x32xf32>,
    return
  }
  func.func @transform_0(%arg0: i32) -> (i32, i32, i32) {
    %c0_i32 = arith.constant 0 : i32
    %c0_i32_0 = arith.constant 0 : i32
    %c0_i32_1 = arith.constant 0 : i32
    return %arg0, %c0_i32, %c0_i32_0 : i32, i32, i32
  }
  func.func @transform_1(%arg0: i32) -> (i32, i32, i32) {
    %c0_i32 = arith.constant 0 : i32
    %c0_i32_0 = arith.constant 0 : i32
    %c0_i32_1 = arith.constant 0 : i32
    return %arg0, %c0_i32, %c0_i32_0 : i32, i32, i32
  }
  func.func @transform_2(%arg0: i32) -> (i32, i32, i32) {
    %c0_i32 = arith.constant 0 : i32
    %c0_i32_0 = arith.constant 0 : i32
    %c0_i32_1 = arith.constant 0 : i32
    return %arg0, %c0_i32, %c0_i32_0 : i32, i32, i32
  }
}

</mosaic_0001>

<bundles_post_ra>
// kernel: tpu_custom_call.1
= control target key start
LH: loop header
LB: loop body
LE: loop exit
PB: predicated region body
PF: predicated region fallthrough
CT: control target
= control target key end

     0   :  { %7 = vsyncpa [#allocation3], 0  ;;  %s274_s0 = inlined_call_operand.hbm [shape: f32[6,4,32], index: 0, kind: input, shape index: {}]   ;;  %s275_s1 = inlined_call_operand.hbm [shape: f32[6,1,32], index: 1, kind: input, shape index: {}]   ;;  %s276_s2 = inlined_call_operand.hbm [shape: f32[6,4,32], index: 2, kind: output, shape index: {}]  }
   0x1   :  { %8 = vsyncpa [#allocation6], 0 }
   0x2   :  { %9 = vsyncpa [#allocation4], 0  ;;  %s204_s9 = smov [#allocation2]   ;;  %s132_s13 = scalar_lea.hbm %s274_s0, 384 }
   0x3   :  { %s15_s10 = sshll.u32 %s204_s9, 4  ;;  %p133_p0 = scmp.ne.s32.totalorder %s274_s0, %s132_s13  ;;  %s16_s10 = int_to_ptr.vmem [resolvable:$true] %s15_s10 }
   0x4   :  { %p136_p1 = scmp.lt.u32.totalorder %s132_s13, %s274_s0 }
   0x6   :  { %p138_p2 = pnand %p136_p1, %p133_p0 }
   0x8   :  { %141 = shalt.err (!%p138_p2)
}
   0x9   :  { %s142_s18 = scalar_lea.vmem %s16_s10, 384  ;;  %p147_p4 = scmp.lt.s32.totalorder %s16_s10, %s16_s10 }
   0xa   :  { %p143_p3 = scmp.ne.s32.totalorder %s16_s10, %s142_s18  ;;  %p148_p5 = scmp.lt.s32.totalorder %s142_s18, %s142_s18 }
   0xc   :  { %p149_p6 = por %p148_p5, %p147_p4 }
   0xe   :  { %p150_p7 = pnand %p149_p6, %p143_p3 }
  0x10   :  { %153 = shalt.err (!%p150_p7)
}
  0x11   :  { %s205_s19 = smov 64   ;;  %s206_s20 = smov 4  }
  0x12   :  { %21 = dma.hbm_to_vmem [thread:$0]  %s274_s0, 384, %s16_s10, [#allocation3], %s205_s19, %s205_s19, %s206_s20  }
  0x13   :  { %s207_s23 = smov [#allocation5]   ;;  %s154_s27 = scalar_lea.hbm %s275_s1, 96 }
  0x14   :  { %s27_s24 = sshll.u32 %s207_s23, 4  ;;  %p155_p8 = scmp.ne.s32.totalorder %s275_s1, %s154_s27  ;;  %s28_s24 = int_to_ptr.vmem [resolvable:$true] %s27_s24 }
  0x15   :  { %p158_p9 = scmp.lt.u32.totalorder %s154_s27, %s275_s1 }
  0x17   :  { %p160_p10 = pnand %p158_p9, %p155_p8 }
  0x19   :  { %163 = shalt.err (!%p160_p10)
}
  0x1a   :  { %s164_s4 = scalar_lea.vmem %s28_s24, 96  ;;  %p169_p12 = scmp.lt.s32.totalorder %s28_s24, %s28_s24 }
  0x1b   :  { %p165_p11 = scmp.ne.s32.totalorder %s28_s24, %s164_s4  ;;  %p170_p13 = scmp.lt.s32.totalorder %s164_s4, %s164_s4 }
  0x1d   :  { %p171_p0 = por %p170_p13, %p169_p12 }
  0x1f   :  { %p172_p1 = pnand %p171_p0, %p165_p11 }
  0x21   :  { %175 = shalt.err (!%p172_p1)
}
  0x22   :  { %s208_s0 = smov 16   ;;  %s209_s5 = smov 1  }
  0x23   :  { %33 = dma.hbm_to_vmem [thread:$0]  %s275_s1, 96, %s28_s24, [#allocation6], %s208_s0, %s208_s0, %s209_s5  }
  0x24   :  { %198 = dma.done.wait [#allocation3], 384  }
  0x25   :  { %199 = vsyncadd [#allocation3], 4294966912 }
  0x26   :  { %200 = dma.done.wait [#allocation6], 96  }
  0x27   :  { %201 = vsyncadd [#allocation6], 4294967200  ;;  %vm94_vm0 = vcmask 257024   ;;  %s210_s8 = smov [#allocation7]   ;;  %v40_v0 = vld [vmem:[#allocation2] sm:$0xf] }
  0x28   :  { %s106_s9 = sshll.u32 %s210_s8, 4  ;;  %v119_v1 = vld [vmem:[#allocation5] ss:$0 sm:$0xff]  ;;  %v41_v2 = vld [vmem:[#allocation2 + $0x4] sm:$0xf]  ;;  %s107_s9 = int_to_ptr.vmem [resolvable:$true] %s106_s9 }
  0x29   :  { %v88_v3 = vadd.f32 %v119_v1, %v40_v0  ;;  %v120_v4 = vld [vmem:[#allocation5 + $0x1] ss:$0 sm:$0xff]  ;;  %v42_v5 = vld [vmem:[#allocation2 + $0x8] sm:$0xf]  ;;  %v121_v6 = vld [vmem:[#allocation5 + $0x2] ss:$0 sm:$0xff]  ;;  %p181_p3 = scmp.lt.s32.totalorder %s107_s9, %s107_s9 }
  0x2a   :  { %v89_v7 = vadd.f32 %v120_v4, %v41_v2  ;;  %v90_v8 = vadd.f32 %v121_v6, %v42_v5  ;;  %v43_v9 = vld [vmem:[#allocation2 + $0xc] sm:$0xf]  ;;  %v122_v10 = vld [vmem:[#allocation5 + $0x3] ss:$0 sm:$0xff]  ;;  %v44_v11 = vld [vmem:[#allocation2 + $0x10] sm:$0xf] }
  0x2b   :  { %95 = vst.msk [vmem:[#allocation7] sm:$0xf] %vm94_vm0, %v88_v3  ;;  %v91_v12 = vadd.f32 %v122_v10, %v43_v9  ;;  %v123_v13 = vld [vmem:[#allocation5 + $0x4] ss:$0 sm:$0xff]  ;;  %v45_v14 = vld [vmem:[#allocation2 + $0x14] sm:$0xf] }
  0x2c   :  { %v124_v15 = vld [vmem:[#allocation5 + $0x5] ss:$0 sm:$0xff]  ;;  %96 = vst.msk [vmem:[#allocation7 + $0x4] sm:$0xf] %vm94_vm0, %v89_v7  ;;  %97 = vst.msk [vmem:[#allocation7 + $0x8] sm:$0xf] %vm94_vm0, %v90_v8  ;;  %v92_v16 = vadd.f32 %v123_v13, %v44_v11 }
  0x2d   :  { %v93_v17 = vadd.f32 %v124_v15, %v45_v14  ;;  %98 = vst.msk [vmem:[#allocation7 + $0xc] sm:$0xf] %vm94_vm0, %v91_v12  ;;  %s176_s1 = scalar_lea.vmem %s107_s9, 384 }
  0x2e   :  { %99 = vst.msk [vmem:[#allocation7 + $0x10] sm:$0xf] %vm94_vm0, %v92_v16  ;;  %p177_p2 = scmp.ne.s32.totalorder %s107_s9, %s176_s1  ;;  %p182_p4 = scmp.lt.s32.totalorder %s176_s1, %s176_s1 }
  0x2f   :  { %100 = vst.msk [vmem:[#allocation7 + $0x14] sm:$0xf] %vm94_vm0, %v93_v17 }
  0x30   :  { %p183_p5 = por %p182_p4, %p181_p3 }
  0x32   :  { %p184_p6 = pnand %p183_p5, %p177_p2 }
  0x34   :  { %187 = shalt.err (!%p184_p6)
}
  0x35   :  { %s188_s12 = scalar_lea.hbm %s276_s2, 384 }
  0x36   :  { %p189_p7 = scmp.ne.s32.totalorder %s276_s2, %s188_s12  ;;  %p192_p8 = scmp.lt.u32.totalorder %s188_s12, %s276_s2 }
  0x38   :  { %p194_p9 = pnand %p192_p8, %p189_p7 }
  0x3a   :  { %197 = shalt.err (!%p194_p9)
}
  0x3b   :  { %112 = dma.vmem_to_hbm [thread:$0]  %s107_s9, 384, %s276_s2, [#allocation4], %s205_s19, %s205_s19, %s206_s20  }
  0x3c   :  { %202 = dma.done.wait [#allocation4], 384  }
  0x3d   :  { %203 = vsyncadd [#allocation4], 4294966912 }
  0x3e   :  { %116 = vsyncpa [#allocation3], 1 }
  0x3f   :  { %117 = vsyncpa [#allocation6], 1 }
  0x40   :  { %118 = vsyncpa [#allocation4], 1 }

</bundles_post_ra>
